<compile_context>
chip_gen: v7x
topology: tpu7x:2x2x1
jax: 0.10.0
libtpu: 0.0.40
codegen_flags: <defaults>
</compile_context>

<pallas_src>
import jax
import jax.numpy as jnp
from jax.experimental import pallas as pl
from jax.experimental.pallas import tpu as pltpu

NUM_FEATURES = 16
NUM_CLASSES = 8
HIDDEN = NUM_FEATURES * 2            # 32
W12_COLS = 2 * HIDDEN                # 64 (fused tanh/sigmoid branch width)
W_SLAB_ROWS = NUM_FEATURES + HIDDEN  # 48: w0 rows | w1&w2 rows
MAX_TILE_B = 2048                    # max batch rows per grid step
MIN_TILES_HINT = 4                   # prefer >= 4 grid steps (v7x: keep both TCs busy)


def net_kernel(x_ref, w_ref, wo_ref, b_ref, o_ref):
    x = x_ref[...]                                                # (tb, 16)

    # Unpack the weight slab / bias pack with static slices (no extra DMAs).
    w0 = w_ref[0:NUM_FEATURES, 0:HIDDEN]                          # (16, 32)
    w12 = w_ref[NUM_FEATURES:W_SLAB_ROWS, :]                      # (32, 64)
    b0 = b_ref[0:1, 0:HIDDEN]                                     # (1, 32)
    b12 = b_ref[1:2, :]                                           # (1, 64)
    bo = b_ref[2:3, 0:NUM_CLASSES]                                # (1, 8)

    # node 1: input edge (Linear 16 -> 32) followed by ReLU
    h1 = jnp.maximum(
        jnp.dot(x, w0, preferred_element_type=jnp.float32) + b0, 0.0)

    # nodes 2 & 3 fused: one (32 -> 64) matmul.  The sigmoid half of w12/b12
    # is pre-scaled by 0.5 at pack time, so a single tanh over the full
    # 64-lane tile yields [tanh(z1), tanh(z2/2)].
    z = jnp.dot(h1, w12, preferred_element_type=jnp.float32) + b12
    t = jnp.tanh(z)                                               # (tb, 64)

    # Output edge with the 1/2 average, the sigmoid affine (0.5*t + 0.5) and
    # the output Linear all folded into wo_fused / bo_fused at pack time.
    o_ref[...] = (jnp.dot(t, wo_ref[...], preferred_element_type=jnp.float32)
                  + bo).astype(o_ref.dtype)


def pack_params(params):
    """Pack PyTorch-convention (out,in) weights once, folding in all the
    activation / averaging constants.  Call this once, outside the hot path."""
    # Weight slab: rows 0:16 = W0 (cols 0:32), rows 16:48 = [W1 | 0.5*W2].
    w_slab = jnp.zeros((W_SLAB_ROWS, W12_COLS), jnp.float32)
    w_slab = w_slab.at[0:NUM_FEATURES, 0:HIDDEN].set(params["w0"].T)
    w12 = jnp.concatenate([params["w1"].T, 0.5 * params["w2"].T], axis=1)
    w_slab = w_slab.at[NUM_FEATURES:, :].set(w12)

    # out = 0.5*(tanh(z1) + 0.5*(tanh(z2/2)+1)) @ Wo + bo
    #     = [tanh(z1), tanh(z2/2)] @ [0.5*Wo ; 0.25*Wo] + (bo + 0.25*sum_rows(Wo))
    wo_t = params["wo"].T                                         # (32, 8)
    wo_fused = jnp.concatenate([0.5 * wo_t, 0.25 * wo_t], axis=0)  # (64, 8)
    bo_fused = params["bo"] + 0.25 * jnp.sum(params["wo"], axis=1)  # (8,)

    # Bias pack: row 0 = b0, row 1 = [b1 | 0.5*b2], row 2 = bo_fused.
    b_pack = jnp.zeros((8, W12_COLS), jnp.float32)
    b_pack = b_pack.at[0, 0:HIDDEN].set(params["b0"])
    b_pack = b_pack.at[1, :].set(
        jnp.concatenate([params["b1"], 0.5 * params["b2"]]))
    b_pack = b_pack.at[2, 0:NUM_CLASSES].set(bo_fused)
    return w_slab, wo_fused, b_pack


def _round_up(n, m):
    return ((n + m - 1) // m) * m


def net_forward(x, packed, *, max_tile_b=MAX_TILE_B):
    """x: (B, 16) float32; packed = pack_params(params)."""
    w_slab, wo_fused, b_pack = packed
    B = x.shape[0]

    # Tile choice: large tiles to amortize per-step overhead, but split into
    # >= MIN_TILES_HINT grid steps when B allows (so v7x's 2 TensorCores both
    # get work) and bound batch-padding waste to < one tile.
    tile_b = max(8, min(max_tile_b, _round_up(pl.cdiv(B, MIN_TILES_HINT), 8)))
    n_tiles = pl.cdiv(B, tile_b)
    b_padded = n_tiles * tile_b
    if b_padded != B:
        x = jnp.pad(x, ((0, b_padded - B), (0, 0)))

    out = pl.pallas_call(
        net_kernel,
        out_shape=jax.ShapeDtypeStruct((b_padded, NUM_CLASSES), jnp.float32),
        grid_spec=pltpu.PrefetchScalarGridSpec(
            num_scalar_prefetch=0,
            grid=(n_tiles,),
            in_specs=[
                pl.BlockSpec((tile_b, NUM_FEATURES), lambda i: (i, 0)),
                pl.BlockSpec((W_SLAB_ROWS, W12_COLS), lambda i: (0, 0)),
                pl.BlockSpec((W12_COLS, NUM_CLASSES), lambda i: (0, 0)),
                pl.BlockSpec((8, W12_COLS), lambda i: (0, 0)),
            ],
            out_specs=pl.BlockSpec((tile_b, NUM_CLASSES), lambda i: (i, 0)),
        ),
        compiler_params=pltpu.CompilerParams(
            dimension_semantics=("parallel",)),
    )(x, w_slab, wo_fused, b_pack)

    if b_padded != B:
        out = out[:B]
    return out


def net_forward_ref(x, params):
    h1 = jax.nn.relu(x @ params["w0"].T + params["b0"])
    h2 = jnp.tanh(h1 @ params["w1"].T + params["b1"])
    h3 = jax.nn.sigmoid(h1 @ params["w2"].T + params["b2"])
    r = (h2 + h3) / 2.0
    return r @ params["wo"].T + params["bo"]


def init_params(key):
    ks = jax.random.split(key, 8)
    scale = 0.1
    return {
        # PyTorch nn.Linear convention: weight (out_features, in_features)
        "w0": scale * jax.random.normal(ks[0], (HIDDEN, NUM_FEATURES), jnp.float32),
        "b0": scale * jax.random.normal(ks[1], (HIDDEN,), jnp.float32),
        "w1": scale * jax.random.normal(ks[2], (HIDDEN, HIDDEN), jnp.float32),
        "b1": scale * jax.random.normal(ks[3], (HIDDEN,), jnp.float32),
        "w2": scale * jax.random.normal(ks[4], (HIDDEN, HIDDEN), jnp.float32),
        "b2": scale * jax.random.normal(ks[5], (HIDDEN,), jnp.float32),
        "wo": scale * jax.random.normal(ks[6], (NUM_CLASSES, HIDDEN), jnp.float32),
        "bo": scale * jax.random.normal(ks[7], (NUM_CLASSES,), jnp.float32),
    }


if __name__ == "__main__":
    key = jax.random.PRNGKey(0)
    pkey, xkey, xkey2 = jax.random.split(key, 3)
    params = init_params(pkey)
    packed = pack_params(params)          # hoisted: pack once, reuse per call

    # Small test (single grid step, batch already a sublane multiple).
    B = 8
    x = jax.random.normal(xkey, (B, NUM_FEATURES), jnp.float32)
    out = jax.block_until_ready(net_forward(x, packed))
    ref = net_forward_ref(x, params)
    assert out.shape == (B, NUM_CLASSES)
    assert jnp.allclose(out, ref, atol=2e-5, rtol=1e-5)

    # Multi-tile test: exercises the batch grid + batch-padding path
    # (B=40 -> tile_b=16, 3 grid steps, 8 padded rows sliced off).
    B2 = 40
    x2 = jax.random.normal(xkey2, (B2, NUM_FEATURES), jnp.float32)
    out2 = jax.block_until_ready(net_forward(x2, packed))
    ref2 = net_forward_ref(x2, params)
    assert out2.shape == (B2, NUM_CLASSES)
    assert jnp.allclose(out2, ref2, atol=2e-5, rtol=1e-5)

    print("KERNEL_OK")
</pallas_src>

<mosaic_0001>
module attributes {stable_mosaic.version = 11 : i64} {
  func.func @net_kernel(%arg0: i32, %arg1: memref<8x16xf32, #tpu.memory_space<vmem>>, %arg2: memref<48x64xf32, #tpu.memory_space<vmem>>, %arg3: memref<64x8xf32, #tpu.memory_space<vmem>>, %arg4: memref<8x64xf32, #tpu.memory_space<vmem>>, %arg5: memref<8x8xf32, #tpu.memory_space<vmem>>) attributes {dimension_semantics = [#tpu.dimension_semantics<parallel>], iteration_bounds = array<i64: 1>, scalar_prefetch = 0 : i64, scratch_operands = 0 : i64, tpu.core_type = #tpu.core_type<tc>, window_params = [{transform_indices = @transform_0, window_bounds = array<i64: 8, 16>}, {pipeline_mode = #tpu.pipeline_mode<synchronous>, transform_indices = @transform_1, window_bounds = array<i64: 48, 64>}, {pipeline_mode = #tpu.pipeline_mode<synchronous>, transform_indices = @transform_2, window_bounds = array<i64: 64, 8>}, {pipeline_mode = #tpu.pipeline_mode<synchronous>, transform_indices = @transform_3, window_bounds = array<i64: 8, 64>}, {transform_indices = @transform_4, window_bounds = array<i64: 8, 8>}]} {
    %c0 = arith.constant 0 : index
    %c0_0 = arith.constant 0 : index
    %0 = vector.load %arg1[%c0, %c0_0] : memref<8x16xf32, #tpu.memory_space<vmem>>, vector<8x16xf32>
    %c0_1 = arith.constant 0 : index
    %c0_2 = arith.constant 0 : index
    %1 = vector.load %arg2[%c0_1, %c0_2] : memref<48x64xf32, #tpu.memory_space<vmem>>, vector<16x32xf32>
    %c16 = arith.constant 16 : index
    %c0_3 = arith.constant 0 : index
    %2 = vector.load %arg2[%c16, %c0_3] : memref<48x64xf32, #tpu.memory_space<vmem>>, vector<32x64xf32>
    %c0_4 = arith.constant 0 : index
    %c0_5 = arith.constant 0 : index
    %3 = vector.load %arg4[%c0_4, %c0_5] : memref<8x64xf32, #tpu.memory_space<vmem>>, vector<1x32xf32>
    %c1 = arith.constant 1 : index
    %c0_6 = arith.constant 0 : index
    %4 = vector.load %arg4[%c1, %c0_6] : memref<8x64xf32, #tpu.memory_space<vmem>>, vector<1x64xf32>
    %c2 = arith.constant 2 : index
    %c0_7 = arith.constant 0 : index
    %5 = vector.load %arg4[%c2, %c0_7] : memref<8x64xf32, #tpu.memory_space<vmem>>, vector<1x8xf32>
    %cst = arith.constant dense<0.000000e+00> : vector<8x32xf32>
    %6 = tpu.matmul %0, %1, %cst {dimension_numbers = #tpu.dot_dimension_numbers<[1], [0], [0], [1], [0, 0, 1, 1], [], []>} : vector<8x16xf32>, vector<16x32xf32>, vector<8x32xf32> -> vector<8x32xf32>
    %7 = vector.broadcast %3 : vector<1x32xf32> to vector<8x32xf32>
    %8 = arith.addf %6, %7 : vector<8x32xf32>
    %cst_8 = arith.constant 0.000000e+00 : f32
    %9 = vector.broadcast %cst_8 : f32 to vector<8x32xf32>
    %10 = arith.maximumf %8, %9 : vector<8x32xf32>
    %cst_9 = arith.constant dense<0.000000e+00> : vector<8x64xf32>
    %11 = tpu.matmul %10, %2, %cst_9 {dimension_numbers = #tpu.dot_dimension_numbers<[1], [0], [0], [1], [0, 0, 1, 1], [], []>} : vector<8x32xf32>, vector<32x64xf32>, vector<8x64xf32> -> vector<8x64xf32>
    %12 = vector.broadcast %4 : vector<1x64xf32> to vector<8x64xf32>
    %13 = arith.addf %11, %12 : vector<8x64xf32>
    %14 = math.tanh %13 : vector<8x64xf32>
    %c0_10 = arith.constant 0 : index
    %c0_11 = arith.constant 0 : index
    %15 = vector.load %arg3[%c0_10, %c0_11] : memref<64x8xf32, #tpu.memory_space<vmem>>, vector<64x8xf32>
    %cst_12 = arith.constant dense<0.000000e+00> : vector<8x8xf32>
    %16 = tpu.matmul %14, %15, %cst_12 {dimension_numbers = #tpu.dot_dimension_numbers<[1], [0], [0], [1], [0, 0, 1, 1], [], []>} : vector<8x64xf32>, vector<64x8xf32>, vector<8x8xf32> -> vector<8x8xf32>
    %17 = vector.broadcast %5 : vector<1x8xf32> to vector<8x8xf32>
    %18 = arith.addf %16, %17 : vector<8x8xf32>
    %c0_13 = arith.constant 0 : index
    %c0_14 = arith.constant 0 : index
    %19 = vector.load %arg5[%c0_13, %c0_14] : memref<8x8xf32, #tpu.memory_space<vmem>>, vector<8x8xf32>
    tpu.vector_store %arg5[%c0_13, %c0_14], %18 {strides = array<i32>} : memref<8x8xf32, #tpu.memory_space<vmem>>, vector<8x8xf32>,
    return
  }
  func.func @transform_0(%arg0: i32) -> (i32, i32) {
    %c0_i32 = arith.constant 0 : i32
    %c0_i32_0 = arith.constant 0 : i32
    return %arg0, %c0_i32 : i32, i32
  }
  func.func @transform_1(%arg0: i32) -> (i32, i32) {
    %c0_i32 = arith.constant 0 : i32
    %c0_i32_0 = arith.constant 0 : i32
    %c0_i32_1 = arith.constant 0 : i32
    return %c0_i32, %c0_i32_0 : i32, i32
  }
  func.func @transform_2(%arg0: i32) -> (i32, i32) {
    %c0_i32 = arith.constant 0 : i32
    %c0_i32_0 = arith.constant 0 : i32
    %c0_i32_1 = arith.constant 0 : i32
    return %c0_i32, %c0_i32_0 : i32, i32
  }
  func.func @transform_3(%arg0: i32) -> (i32, i32) {
    %c0_i32 = arith.constant 0 : i32
    %c0_i32_0 = arith.constant 0 : i32
    %c0_i32_1 = arith.constant 0 : i32
    return %c0_i32, %c0_i32_0 : i32, i32
  }
  func.func @transform_4(%arg0: i32) -> (i32, i32) {
    %c0_i32 = arith.constant 0 : i32
    %c0_i32_0 = arith.constant 0 : i32
    return %arg0, %c0_i32 : i32, i32
  }
}

</mosaic_0001>

<bundles_post_ra>
// kernel: tpu_custom_call.1
= control target key start
LH: loop header
LB: loop body
LE: loop exit
PB: predicated region body
PF: predicated region fallthrough
CT: control target
= control target key end

     0   :  { %v399_v2 = vmov 0.0|0.0   ;;  %vm400_vm0 = vmmov 0   ;;  %v401_v4 = vmov 0.0   ;;  %s494_s0 = inlined_call_operand.vmem [shape: f32[8,16], index: 0, kind: input, shape index: {}]   ;;  %s495_s1 = inlined_call_operand.vmem [shape: f32[48,64], index: 1, kind: input, shape index: {}]   ;;  %s496_s2 = inlined_call_operand.vmem [shape: f32[64,8], index: 2, kind: input, shape index: {}]   ;;  %s497_s3 = inlined_call_operand.vmem [shape: f32[8,64], index: 3, kind: input, shape index: {}]   ;;  %s498_s4 = inlined_call_operand.hbm [shape: f32[8,8], index: 4, kind: output, shape index: {}]  }
   0x1   :  { %v19_v0 = vld [vmem:[%s495_s1] sm:$0xff]  ;;  %v20_v1 = vld [vmem:[%s495_s1 + $0x8] sm:$0xff]  ;;  %348 = vmatprep.subr.bf16.mxu1 %v399_v2  ;;  %315 = vmatprep.mubr.msk.f32.mxu1 %vm400_vm0, %v401_v4  ;;  %v21_v5 = vld [vmem:[%s495_s1 + $0x10] sm:$0xff] }
   0x2   :  { %v349_v3 = vpack.c.bf16 %v20_v1, %v19_v0  ;;  %v22_v6 = vld [vmem:[%s495_s1 + $0x18] sm:$0xff]  ;;  %357 = vmatprep.subr.bf16.mxu0 %v399_v2  ;;  %345 = vmatprep.mubr.msk.f32.mxu0 %vm400_vm0, %v401_v4 }
   0x3   :  { %9 = vsyncpa [#allocation3], 0  ;;  %v18_v7 = vld [vmem:[%s494_s0] sm:$0xff]  ;;  %vm32_vm1 = vcmask 130048   ;;  %v352_v8 = vpack.c.bf16 %v22_v6, %v21_v5  ;;  %v24_v10 = vld [vmem:[%s495_s1 + $0x28] sm:$0xff]  ;;  %vm111_vm2 = vcmask 261120  }
   0x4   :  { %350 = vmatpush3.bf16.msra.mxu1 %v349_v3  ;;  %v23_v9 = vld [vmem:[%s495_s1 + $0x20] sm:$0xff]  ;;  %v187_v13 = vld [vmem:[%s496_s2 + $0x8] sm:$0xff]  ;;  %v188_v20 = vld [vmem:[%s496_s2 + $0x10] sm:$0xff]  ;;  %vm198_vm3 = vcmask 523264   ;;  %vm272_vm4 = vcmask 64512  }
   0x5   :  { %351 = vmatprep.subr.bf16.mxu1 %v399_v2  ;;  %v355_v11 = vpack.c.bf16 %v24_v10, %v23_v9  ;;  %v186_v12 = vld [vmem:[%s496_s2] sm:$0xff]  ;;  %v189_v21 = vld [vmem:[%s496_s2 + $0x18] sm:$0xff]  ;;  %v191_v24 = vld [vmem:[%s496_s2 + $0x28] sm:$0xff] }
   0x6   :  { %v358_v14 = vpack.c.bf16 %v187_v13, %v186_v12  ;;  %v288_v15 = vld [vmem:[%s497_s3] ss:$0 sm:$0xff]  ;;  %v361_v22 = vpack.c.bf16 %v189_v21, %v188_v20  ;;  %v192_v26 = vld [vmem:[%s496_s2 + $0x30] sm:$0xff]  ;;  %v193_v27 = vld [vmem:[%s496_s2 + $0x38] sm:$0xff] }
   0x7   :  { %316 = vmatmul.mubr.msk.f32.vlgmr.msra.gmra.mrb[0].mxu1 %vm32_vm1, %v18_v7  ;;  %v190_v23 = vld [vmem:[%s496_s2 + $0x20] sm:$0xff]  ;;  %v367_v28 = vpack.c.bf16 %v193_v27, %v192_v26  ;;  %s402_s2 = smov [#allocation2]  }
   0x8   :  { %353 = vmatpush3.bf16.msra.mxu1 %v352_v8  ;;  %326 = vmatprep.mubr.msk.f32.mxu1 %vm400_vm0, %v401_v4  ;;  %v364_v25 = vpack.c.bf16 %v191_v24, %v190_v23  ;;  %v290_v29 = vld [vmem:[%s497_s3 + $0x1] ss:$0 sm:$0xff]  ;;  %v292_v34 = vld [vmem:[%s497_s3 + $0x2] ss:$0 sm:$0xff]  ;;  %s280_s23 = sshll.u32 %s402_s2, 4  ;;  %s281_s23 = int_to_ptr.vmem [resolvable:$true] %s280_s23 }
   0x9   :  { %354 = vmatprep.subr.bf16.mxu1 %v399_v2  ;;  %359 = vmatpush3.bf16.msra.mxu0 %v358_v14  ;;  %s375_s24 = scalar_lea.vmem %s281_s23, 128  ;;  %p380_p1 = scmp.lt.s32.totalorder %s281_s23, %s281_s23 }
   0xa   :  { %360 = vmatprep.subr.bf16.mxu0 %v399_v2  ;;  %p376_p0 = scmp.ne.s32.totalorder %s281_s23, %s375_s24  ;;  %p381_p2 = scmp.lt.s32.totalorder %s375_s24, %s375_s24 }
   0xc   :  { %356 = vmatpush3.bf16.msra.mxu1 %v355_v11  ;;  %p382_p3 = por %p381_p2, %p380_p1 }
   0xd   :  { %362 = vmatpush3.bf16.msra.mxu0 %v361_v22 }
   0xe   :  { %363 = vmatprep.subr.bf16.mxu0 %v399_v2  ;;  %p383_p4 = pnand %p382_p3, %p376_p0 }
  0x11   :  { %365 = vmatpush3.bf16.msra.mxu0 %v364_v25 }
  0x12   :  { %366 = vmatprep.subr.bf16.mxu0 %v399_v2 }
  0x15   :  { %368 = vmatpush3.bf16.msra.mxu0 %v367_v28 }
  0xda   :  { %v102_v16 = vpop.f32.mrb[0].mxu1 }
  0xdb   :  { %v103_v17 = vadd.f32 %v288_v15, %v102_v16  ;;  %v317_v18 = vpop.f32.mrb[1].mxu1 }
  0xdd   :  { %v106_v19 = vmax.f32 %v103_v17, 0.0 }
  0xdf   :  { %327 = vmatmul.mubr.msk.f32.vlgmr.msra.gmra.mrb[2].mxu1 %vm111_vm2, %v106_v19 }
 0x1b2   :  { %v181_v30 = vpop.f32.mrb[2].mxu1 }
 0x1b3   :  { %v182_v31 = vadd.f32 %v290_v29, %v181_v30  ;;  %v328_v32 = vpop.f32.mrb[3].mxu1 }
 0x1b5   :  { %373 = vtanh.f32 %v182_v31 }
 0x1bf   :  { %v374_v33 = vpop.eup %373 }
 0x1c0   :  { %346 = vmatmul.mubr.msk.f32.vlgmr.msra.gmra.mrb[0].mxu0 %vm198_vm3, %v374_v33 }
 0x293   :  { %v268_v35 = vpop.f32.mrb[0].mxu0 }
 0x294   :  { %v269_v36 = vadd.f32 %v292_v34, %v268_v35  ;;  %v347_v37 = vpop.f32.mrb[1].mxu0 }
 0x296   :  { %273 = vst.msk [vmem:[#allocation2] sm:$0xff] %vm272_vm4, %v269_v36 }
 0x297   :  { %386 = shalt.err (!%p383_p4)
}
 0x298   :  { %s387_s27 = scalar_lea.hbm %s498_s4, 128 }
 0x299   :  { %p388_p5 = scmp.ne.s32.totalorder %s498_s4, %s387_s27  ;;  %p391_p6 = scmp.lt.u32.totalorder %s387_s27, %s498_s4 }
 0x29b   :  { %p393_p7 = pnand %p391_p6, %p388_p5 }
 0x29d   :  { %396 = shalt.err (!%p393_p7)
}
 0x29e   :  { %283 = dma.vmem_to_hbm [thread:$0]  %s281_s23, 128, %s498_s4, [#allocation3]  }
 0x29f   :  { %397 = dma.done.wait [#allocation3], 128  }
 0x2a0   :  { %398 = vsyncadd [#allocation3], 4294967168 }
 0x2a1   :  { %287 = vsyncpa [#allocation3], 1 }

</bundles_post_ra>
